<compile_context>
chip_gen: v7x
topology: tpu7x:2x2x1
jax: 0.10.0
libtpu: 0.0.40
codegen_flags: <defaults>
</compile_context>

<pallas_src>
import jax
import jax.numpy as jnp
from jax import lax
from jax.experimental import pallas as pl
from jax.experimental.pallas import tpu as pltpu


# ---------------------------------------------------------------------------
# Kernels
# ---------------------------------------------------------------------------

def _cosine_kernel_single_k(x_ref, w_ref, xinv_ref, winv_ref, o_ref):
    """Full-D path: one MXU pass per (i, j) output tile, post-scaled."""
    acc = lax.dot_general(
        x_ref[...], w_ref[...],
        dimension_numbers=(((1,), (1,)), ((), ())),   # contract last dims; no W.T
        preferred_element_type=jnp.float32,
    )
    o_ref[...] = (acc * xinv_ref[...] * winv_ref[...]).astype(o_ref.dtype)


def _cosine_kernel_tiled_k_acc(x_ref, w_ref, xinv_ref, winv_ref, o_ref, acc_ref):
    """Tiled-K path with f32 scratch accumulator (non-f32 output dtype)."""
    k = pl.program_id(2)

    @pl.when(k == 0)
    def _():
        acc_ref[...] = jnp.zeros_like(acc_ref)

    acc_ref[...] += lax.dot_general(
        x_ref[...], w_ref[...],
        dimension_numbers=(((1,), (1,)), ((), ())),
        preferred_element_type=jnp.float32,
    )

    @pl.when(k == pl.num_programs(2) - 1)
    def _():
        o_ref[...] = (acc_ref[...] * xinv_ref[...] * winv_ref[...]).astype(o_ref.dtype)


def _cosine_kernel_tiled_k_f32out(x_ref, w_ref, xinv_ref, winv_ref, o_ref):
    """Tiled-K path accumulating directly into the resident f32 output tile."""
    k = pl.program_id(2)

    @pl.when(k == 0)
    def _():
        o_ref[...] = jnp.zeros_like(o_ref)

    o_ref[...] += lax.dot_general(
        x_ref[...], w_ref[...],
        dimension_numbers=(((1,), (1,)), ((), ())),
        preferred_element_type=jnp.float32,
    )

    @pl.when(k == pl.num_programs(2) - 1)
    def _():
        o_ref[...] = o_ref[...] * xinv_ref[...] * winv_ref[...]


# ---------------------------------------------------------------------------
# Wrapper
# ---------------------------------------------------------------------------

def _round_up(x, m):
    return (x + m - 1) // m * m


def cosine_linear(x, weight, sigma, *, eps=1e-12, tm=256, tn=256, tk=None,
                  mxu_dtype=None, vmem_budget_bytes=12 * 1024 * 1024):
    """CosineLinear forward.

    x: (B, D), weight: (O, D), sigma: scalar or (1,).  Returns (B, O) in x.dtype.

    tk=None  -> auto: single full-D pass when it fits the VMEM budget, else the
                largest 128-multiple divisor of round_up(D,128) that is <= 512.
                Pass tk explicitly to force a particular K tiling.
    mxu_dtype: optionally cast x/W tiles (e.g. jnp.bfloat16) for the MXU fast
               path on v6e/v7x; accumulation stays f32.
    """
    B, D = x.shape
    O, D2 = weight.shape
    assert D == D2, (D, D2)
    out_dtype = x.dtype

    in_dtype = mxu_dtype if mxu_dtype is not None else x.dtype
    in_bytes = jnp.dtype(in_dtype).itemsize
    out_bytes = jnp.dtype(out_dtype).itemsize

    # ---- tile selection ---------------------------------------------------
    Dp = _round_up(D, 128)
    tm = max(8, min(int(tm), _round_up(B, 8)))
    tm = _round_up(tm, 8)
    tn = max(128, min(int(tn), _round_up(O, 128)))
    tn = _round_up(tn, 128)
    Bp = _round_up(B, tm)
    Op = _round_up(O, tn)

    # v7x has 2 TensorCores: if the parallel (i, j) grid collapsed to a single
    # tile, halve one tile axis (when legal) so both cores get work.
    if (Bp // tm) * (Op // tn) < 2:
        if tn >= 256 and tn % 256 == 0:
            tn //= 2
        elif tm >= 16 and (tm // 2) % 8 == 0:
            tm //= 2

    # ---- K tiling -----------------------------------------------------------
    single_k_vmem = (2 * (tm + tn) * Dp * in_bytes     # double-buffered x/w tiles
                     + 2 * (tm + tn) * 4                # inverse-norm rows
                     + 2 * tm * tn * out_bytes)         # output tile
    if tk is None:
        single_k = single_k_vmem <= vmem_budget_bytes
        if not single_k:
            tk = min(512, Dp)
    else:
        tk = min(_round_up(int(tk), 128), Dp)
        single_k = tk >= Dp
    if not single_k:
        tk = (tk // 128) * 128
        while Dp % tk != 0:              # tk divides Dp -> no K zero-padding
            tk -= 128

    # ---- pad & cast inputs --------------------------------------------------
    xp = x if (Bp == B and Dp == D) else jnp.pad(x, ((0, Bp - B), (0, Dp - D)))
    wp = weight if (Op == O and Dp == D) else jnp.pad(weight, ((0, Op - O), (0, Dp - D)))
    if xp.dtype != jnp.dtype(in_dtype):
        xp = xp.astype(in_dtype)
    if wp.dtype != jnp.dtype(in_dtype):
        wp = wp.astype(in_dtype)

    # ---- hoisted row-norm reciprocals (one eps for both sides) ---------------
    # NOTE: inv_w_sigma is batch-independent; callers running repeated inference
    # should cache it alongside the weight to avoid an extra HBM pass over W.
    eps2 = jnp.float32(eps) * jnp.float32(eps)
    xf = x.astype(jnp.float32)
    inv_x = lax.rsqrt(jnp.maximum(jnp.sum(xf * xf, axis=1), eps2))               # (B,)
    wf = weight.astype(jnp.float32)
    sig = jnp.asarray(sigma, jnp.float32).reshape(-1)[0]
    inv_w_sigma = lax.rsqrt(jnp.maximum(jnp.sum(wf * wf, axis=1), eps2)) * sig   # (O,)

    if Bp != B:
        inv_x = jnp.pad(inv_x, (0, Bp - B))
    if Op != O:
        inv_w_sigma = jnp.pad(inv_w_sigma, (0, Op - O))
    inv_x = inv_x.reshape(Bp, 1)
    inv_w_sigma = inv_w_sigma.reshape(1, Op)

    grid_m, grid_n = Bp // tm, Op // tn

    cost = pl.CostEstimate(
        flops=2 * Bp * Op * Dp,
        transcendentals=0,
        # X is re-streamed once per output-column tile, W once per row tile.
        bytes_accessed=int(xp.size * in_bytes * grid_n
                           + wp.size * in_bytes * grid_m
                           + Bp * Op * out_bytes
                           + (Bp + Op) * 4),
    )

    if single_k:
        out = pl.pallas_call(
            _cosine_kernel_single_k,
            out_shape=jax.ShapeDtypeStruct((Bp, Op), out_dtype),
            grid=(grid_m, grid_n),
            in_specs=[
                pl.BlockSpec((tm, Dp), lambda i, j: (i, 0)),    # x tile (full D)
                pl.BlockSpec((tn, Dp), lambda i, j: (j, 0)),    # w tile (full D)
                pl.BlockSpec((tm, 1), lambda i, j: (i, 0)),     # 1/||x|| column
                pl.BlockSpec((1, tn), lambda i, j: (0, j)),     # sigma/||w|| row
            ],
            out_specs=pl.BlockSpec((tm, tn), lambda i, j: (i, j)),
            compiler_params=pltpu.CompilerParams(
                dimension_semantics=("parallel", "parallel")),
            cost_estimate=cost,
        )(xp, wp, inv_x, inv_w_sigma)
    else:
        grid = (grid_m, grid_n, Dp // tk)
        in_specs = [
            pl.BlockSpec((tm, tk), lambda i, j, k: (i, k)),     # x tile
            pl.BlockSpec((tn, tk), lambda i, j, k: (j, k)),     # w tile
            pl.BlockSpec((tm, 1), lambda i, j, k: (i, 0)),      # 1/||x|| column
            pl.BlockSpec((1, tn), lambda i, j, k: (0, j)),      # sigma/||w|| row
        ]
        out_spec = pl.BlockSpec((tm, tn), lambda i, j, k: (i, j))
        cparams = pltpu.CompilerParams(
            dimension_semantics=("parallel", "parallel", "arbitrary"))
        if jnp.dtype(out_dtype) == jnp.dtype(jnp.float32):
            out = pl.pallas_call(
                _cosine_kernel_tiled_k_f32out,
                out_shape=jax.ShapeDtypeStruct((Bp, Op), out_dtype),
                grid=grid, in_specs=in_specs, out_specs=out_spec,
                compiler_params=cparams, cost_estimate=cost,
            )(xp, wp, inv_x, inv_w_sigma)
        else:
            out = pl.pallas_call(
                _cosine_kernel_tiled_k_acc,
                out_shape=jax.ShapeDtypeStruct((Bp, Op), out_dtype),
                grid=grid, in_specs=in_specs, out_specs=out_spec,
                scratch_shapes=[pltpu.VMEM((tm, tn), jnp.float32)],
                compiler_params=cparams, cost_estimate=cost,
            )(xp, wp, inv_x, inv_w_sigma)

    return out[:B, :O]


# ---------------------------------------------------------------------------
# Reference & test
# ---------------------------------------------------------------------------

def reference(x, weight, sigma, eps=1e-12):
    xn = x / jnp.maximum(jnp.linalg.norm(x, axis=1, keepdims=True), eps)
    wn = weight / jnp.maximum(jnp.linalg.norm(weight, axis=1, keepdims=True), eps)
    return (xn @ wn.T) * jnp.asarray(sigma, jnp.float32).reshape(-1)[0]


if __name__ == "__main__":
    key = jax.random.PRNGKey(0)
    k1, k2, k3, k4 = jax.random.split(key, 4)

    # ---- case 1: module-sized shapes, single-K fast path --------------------
    batch, in_features, out_features = 8, 32, 16
    # Deterministic init mirroring CosineLinear.reset_parameters():
    #   weight ~ U(-std, std), std = 1/sqrt(in_features); sigma = 1.0
    std = 1.0 / (in_features ** 0.5)
    weight = jax.random.uniform(k1, (out_features, in_features), jnp.float32,
                                minval=-std, maxval=std)
    sigma = jnp.ones((1,), jnp.float32)
    x = jax.random.normal(k2, (batch, in_features), jnp.float32)

    out = jax.block_until_ready(cosine_linear(x, weight, sigma))
    ref = reference(x, weight, sigma)
    assert out.shape == (batch, out_features)
    assert jnp.allclose(out, ref, atol=1e-5, rtol=1e-5), "mismatch (single-K path)"

    # ---- case 2: forced tiled-K path (f32 output accumulates in place) ------
    batch2, in2, out2 = 16, 512, 256
    std2 = 1.0 / (in2 ** 0.5)
    weight2 = jax.random.uniform(k3, (out2, in2), jnp.float32,
                                 minval=-std2, maxval=std2)
    x2 = jax.random.normal(k4, (batch2, in2), jnp.float32)

    out_t = jax.block_until_ready(cosine_linear(x2, weight2, sigma, tk=256))
    ref_t = reference(x2, weight2, sigma)
    assert out_t.shape == (batch2, out2)
    assert jnp.allclose(out_t, ref_t, atol=1e-4, rtol=1e-4), "mismatch (tiled-K path)"

    print("KERNEL_OK")
</pallas_src>

<mosaic_0001>
module attributes {stable_mosaic.version = 11 : i64} {
  func.func @_cosine_kernel_single_k(%arg0: i32, %arg1: i32, %arg2: memref<8x128xf32, #tpu.memory_space<vmem>>, %arg3: memref<128x128xf32, #tpu.memory_space<vmem>>, %arg4: memref<8x1xf32, #tpu.memory_space<vmem>>, %arg5: memref<1x128xf32, #tpu.memory_space<vmem>>, %arg6: memref<8x128xf32, #tpu.memory_space<vmem>>) attributes {dimension_semantics = [#tpu.dimension_semantics<parallel>, #tpu.dimension_semantics<parallel>], iteration_bounds = array<i64: 1, 1>, scalar_prefetch = 0 : i64, scratch_operands = 0 : i64, tpu.core_type = #tpu.core_type<tc>, window_params = [{transform_indices = @transform_0, window_bounds = array<i64: 8, 128>}, {transform_indices = @transform_1, window_bounds = array<i64: 128, 128>}, {transform_indices = @transform_2, window_bounds = array<i64: 8, 1>}, {transform_indices = @transform_3, window_bounds = array<i64: 1, 128>}, {transform_indices = @transform_4, window_bounds = array<i64: 8, 128>}]} {
    %c0 = arith.constant 0 : index
    %c0_0 = arith.constant 0 : index
    %0 = vector.load %arg2[%c0, %c0_0] : memref<8x128xf32, #tpu.memory_space<vmem>>, vector<8x128xf32>
    %c0_1 = arith.constant 0 : index
    %c0_2 = arith.constant 0 : index
    %1 = vector.load %arg3[%c0_1, %c0_2] : memref<128x128xf32, #tpu.memory_space<vmem>>, vector<128x128xf32>
    %cst = arith.constant dense<0.000000e+00> : vector<8x128xf32>
    %2 = tpu.matmul %0, %1, %cst {dimension_numbers = #tpu.dot_dimension_numbers<[1], [1], [0], [0], [0, 0, 1, 0], [], []>} : vector<8x128xf32>, vector<128x128xf32>, vector<8x128xf32> -> vector<8x128xf32>
    %c0_3 = arith.constant 0 : index
    %c0_4 = arith.constant 0 : index
    %3 = vector.load %arg4[%c0_3, %c0_4] : memref<8x1xf32, #tpu.memory_space<vmem>>, vector<8x1xf32>
    %4 = vector.broadcast %3 : vector<8x1xf32> to vector<8x128xf32>
    %5 = arith.mulf %2, %4 : vector<8x128xf32>
    %c0_5 = arith.constant 0 : index
    %c0_6 = arith.constant 0 : index
    %6 = vector.load %arg5[%c0_5, %c0_6] : memref<1x128xf32, #tpu.memory_space<vmem>>, vector<1x128xf32>
    %7 = vector.broadcast %6 : vector<1x128xf32> to vector<8x128xf32>
    %8 = arith.mulf %5, %7 : vector<8x128xf32>
    %c0_7 = arith.constant 0 : index
    %c0_8 = arith.constant 0 : index
    %9 = vector.load %arg6[%c0_7, %c0_8] : memref<8x128xf32, #tpu.memory_space<vmem>>, vector<8x128xf32>
    tpu.vector_store %arg6[%c0_7, %c0_8], %8 {strides = array<i32>} : memref<8x128xf32, #tpu.memory_space<vmem>>, vector<8x128xf32>,
    return
  }
  func.func @transform_0(%arg0: i32, %arg1: i32) -> (i32, i32) {
    %c0_i32 = arith.constant 0 : i32
    %c0_i32_0 = arith.constant 0 : i32
    return %arg0, %c0_i32 : i32, i32
  }
  func.func @transform_1(%arg0: i32, %arg1: i32) -> (i32, i32) {
    %c0_i32 = arith.constant 0 : i32
    %c0_i32_0 = arith.constant 0 : i32
    return %arg1, %c0_i32 : i32, i32
  }
  func.func @transform_2(%arg0: i32, %arg1: i32) -> (i32, i32) {
    %c0_i32 = arith.constant 0 : i32
    %c0_i32_0 = arith.constant 0 : i32
    return %arg0, %c0_i32 : i32, i32
  }
  func.func @transform_3(%arg0: i32, %arg1: i32) -> (i32, i32) {
    %c0_i32 = arith.constant 0 : i32
    %c0_i32_0 = arith.constant 0 : i32
    return %c0_i32, %arg1 : i32, i32
  }
  func.func @transform_4(%arg0: i32, %arg1: i32) -> (i32, i32) {
    %c0_i32 = arith.constant 0 : i32
    return %arg0, %arg1 : i32, i32
  }
}

</mosaic_0001>

<bundles_post_ra>
// kernel: tpu_custom_call.1
= control target key start
LH: loop header
LB: loop body
LE: loop exit
PB: predicated region body
PF: predicated region fallthrough
CT: control target
= control target key end

     0   :  { %9 = vsyncpa [#allocation3], 0  ;;  %s350_s0 = inlined_call_operand.vmem [shape: f32[8,128], index: 0, kind: input, shape index: {}]   ;;  %s351_s1 = inlined_call_operand.hbm [shape: f32[128,128], index: 1, kind: input, shape index: {}]   ;;  %s352_s2 = inlined_call_operand.vmem [shape: f32[8,1], index: 2, kind: input, shape index: {}]   ;;  %s353_s3 = inlined_call_operand.vmem [shape: f32[1,128], index: 3, kind: input, shape index: {}]   ;;  %s354_s4 = inlined_call_operand.hbm [shape: f32[8,128], index: 4, kind: output, shape index: {}]  }
   0x1   :  { %10 = vsyncpa [#allocation4], 0  ;;  %s284_s15 = smov [#allocation2]   ;;  %s236_s19 = scalar_lea.hbm %s351_s1, 2048 }
   0x2   :  { %s18_s16 = sshll.u32 %s284_s15, 4  ;;  %p237_p0 = scmp.ne.s32.totalorder %s351_s1, %s236_s19  ;;  %s19_s16 = int_to_ptr.vmem [resolvable:$true] %s18_s16 }
   0x3   :  { %p240_p1 = scmp.lt.u32.totalorder %s236_s19, %s351_s1 }
   0x5   :  { %p242_p2 = pnand %p240_p1, %p237_p0 }
   0x7   :  { %245 = shalt.err (!%p242_p2)
}
   0x8   :  { %s246_s24 = scalar_lea.vmem %s19_s16, 2048  ;;  %p251_p4 = scmp.lt.s32.totalorder %s19_s16, %s19_s16 }
   0x9   :  { %p247_p3 = scmp.ne.s32.totalorder %s19_s16, %s246_s24  ;;  %p252_p5 = scmp.lt.s32.totalorder %s246_s24, %s246_s24 }
   0xb   :  { %p253_p6 = por %p252_p5, %p251_p4 }
   0xd   :  { %p254_p7 = pnand %p253_p6, %p247_p3 }
   0xf   :  { %257 = shalt.err (!%p254_p7)
}
  0x10   :  { %s285_s25 = smov 128   ;;  %s286_s26 = smov 8  }
  0x11   :  { %24 = dma.hbm_to_vmem [thread:$0]  %s351_s1, 2048, %s19_s16, [#allocation3], %s285_s25, %s285_s25, %s286_s26  }
  0x12   :  { %280 = dma.done.wait [#allocation3], 2048  }
  0x13   :  { %281 = vsyncadd [#allocation3], 4294965248  ;;  %v287_v0 = vmov 0.0|0.0   ;;  %vm288_vm0 = vmmov 0   ;;  %v289_v1 = vmov 0.0   ;;  %v290_v2 = vmov 0  }
  0x14   :  { %203 = vmatprep.subr.bf16.mxu0 %v287_v0  ;;  %200 = vmatprep.mubr.msk.f32.mxu0 %vm288_vm0, %v289_v1  ;;  %v33_v3 = vld [vmem:[#allocation2] sm:$0xff]  ;;  %v34_v4 = vld [vmem:[#allocation2 + $0x8] sm:$0xff]  ;;  %v35_v6 = vld [vmem:[#allocation2 + $0x10] sm:$0xff]  ;;  %s291_s7 = smov [#allocation5]  }
  0x15   :  { %235 = vset.pattern.permute.xlu0 %v290_v2  ;;  %v204_v5 = vpack.c.bf16 %v34_v4, %v33_v3  ;;  %v36_v7 = vld [vmem:[#allocation2 + $0x18] sm:$0xff]  ;;  %v119_v8 = vld [vmem:[%s352_s2] sm:$0xff]  ;;  %v38_v11 = vld [vmem:[#allocation2 + $0x28] sm:$0xff]  ;;  %s141_s8 = sshll.u32 %s291_s7, 4  ;;  %s142_s8 = int_to_ptr.vmem [resolvable:$true] %s141_s8 }
  0x16   :  { %122 = vperm.xlu0 %235, %v119_v8   ;;  %v207_v9 = vpack.c.bf16 %v36_v7, %v35_v6  ;;  %v37_v10 = vld [vmem:[#allocation2 + $0x20] sm:$0xff]  ;;  %v39_v13 = vld [vmem:[#allocation2 + $0x30] sm:$0xff]  ;;  %v40_v14 = vld [vmem:[#allocation2 + $0x38] sm:$0xff]  ;;  %s258_s9 = scalar_lea.vmem %s142_s8, 128  ;;  %p263_p9 = scmp.lt.s32.totalorder %s142_s8, %s142_s8 }
  0x17   :  { %205 = vmatpush3.bf16.xpose.msra.mxu0 %v204_v5  ;;  %v210_v12 = vpack.c.bf16 %v38_v11, %v37_v10  ;;  %v213_v15 = vpack.c.bf16 %v40_v14, %v39_v13  ;;  %v41_v16 = vld [vmem:[#allocation2 + $0x40] sm:$0xff]  ;;  %v42_v17 = vld [vmem:[#allocation2 + $0x48] sm:$0xff]  ;;  %v43_v19 = vld [vmem:[#allocation2 + $0x50] sm:$0xff]  ;;  %p259_p8 = scmp.ne.s32.totalorder %s142_s8, %s258_s9  ;;  %p264_p10 = scmp.lt.s32.totalorder %s258_s9, %s258_s9 }
  0x18   :  { %206 = vmatprep.subr.bf16.mxu0 %v287_v0  ;;  %v216_v18 = vpack.c.bf16 %v42_v17, %v41_v16  ;;  %v44_v20 = vld [vmem:[#allocation2 + $0x58] sm:$0xff]  ;;  %v45_v22 = vld [vmem:[#allocation2 + $0x60] sm:$0xff]  ;;  %v46_v23 = vld [vmem:[#allocation2 + $0x68] sm:$0xff] }
  0x19   :  { %v219_v21 = vpack.c.bf16 %v44_v20, %v43_v19  ;;  %v222_v24 = vpack.c.bf16 %v46_v23, %v45_v22  ;;  %v47_v25 = vld [vmem:[#allocation2 + $0x70] sm:$0xff]  ;;  %v48_v26 = vld [vmem:[#allocation2 + $0x78] sm:$0xff]  ;;  %v32_v28 = vld [vmem:[%s350_s0] sm:$0xff]  ;;  %p265_p11 = por %p264_p10, %p263_p9 }
  0x1a   :  { %v225_v27 = vpack.c.bf16 %v48_v26, %v47_v25  ;;  %v150_v31 = vld [vmem:[%s353_s3] ss:$0 sm:$0xff] }
  0x1b   :  { %p266_p12 = pnand %p265_p11, %p259_p8 }
  0x1f   :  { %208 = vmatpush3.bf16.xpose.msra.mxu0 %v207_v9 }
  0x20   :  { %209 = vmatprep.subr.bf16.mxu0 %v287_v0 }
  0x27   :  { %211 = vmatpush3.bf16.xpose.msra.mxu0 %v210_v12 }
  0x28   :  { %212 = vmatprep.subr.bf16.mxu0 %v287_v0 }
  0x2f   :  { %214 = vmatpush3.bf16.xpose.msra.mxu0 %v213_v15 }
  0x30   :  { %215 = vmatprep.subr.bf16.mxu0 %v287_v0 }
  0x37   :  { %217 = vmatpush3.bf16.xpose.msra.mxu0 %v216_v18 }
  0x38   :  { %218 = vmatprep.subr.bf16.mxu0 %v287_v0 }
  0x3f   :  { %220 = vmatpush3.bf16.xpose.msra.mxu0 %v219_v21 }
  0x40   :  { %221 = vmatprep.subr.bf16.mxu0 %v287_v0 }
  0x47   :  { %223 = vmatpush3.bf16.xpose.msra.mxu0 %v222_v24 }
  0x48   :  { %224 = vmatprep.subr.bf16.mxu0 %v287_v0 }
  0x4f   :  { %226 = vmatpush3.bf16.xpose.msra.mxu0 %v225_v27 }
  0x56   :  { %201 = vmatmul.mubr.f32.vlgmr.msra.gmra.mrb[0].mxu0 %v32_v28 }
  0x95   :  { %v123_v29 = vpop.permute.xlu0 %122 }
 0x129   :  { %v115_v30 = vpop.f32.mrb[0].mxu0 }
 0x12a   :  { %v125_v32 = vmul.f32 %v123_v29, %v115_v30  ;;  %v202_v33 = vpop.f32.mrb[1].mxu0 }
 0x12c   :  { %v133_v34 = vmul.f32 %v150_v31, %v125_v32 }
 0x12e   :  { %134 = vst [vmem:[#allocation5] sm:$0xff] %v133_v34 }
 0x12f   :  { %269 = shalt.err (!%p266_p12)
}
 0x130   :  { %s270_s11 = scalar_lea.hbm %s354_s4, 128 }
 0x131   :  { %p271_p13 = scmp.ne.s32.totalorder %s354_s4, %s270_s11  ;;  %p274_p0 = scmp.lt.u32.totalorder %s270_s11, %s354_s4 }
 0x133   :  { %p276_p1 = pnand %p274_p0, %p271_p13 }
 0x135   :  { %279 = shalt.err (!%p276_p1)
}
 0x136   :  { %144 = dma.vmem_to_hbm [thread:$0]  %s142_s8, 128, %s354_s4, [#allocation4]  }
 0x137   :  { %282 = dma.done.wait [#allocation4], 128  }
 0x138   :  { %283 = vsyncadd [#allocation4], 4294967168 }
 0x139   :  { %148 = vsyncpa [#allocation3], 1 }
 0x13a   :  { %149 = vsyncpa [#allocation4], 1 }

</bundles_post_ra>
